<compile_context>
chip_gen: v6e
topology: v6e:2x2x1
jax: 0.10.0
libtpu: 0.0.40
codegen_flags: <defaults>
</compile_context>

<pallas_src>
import math

import jax
import jax.numpy as jnp
from jax.experimental import pallas as pl
from jax.experimental.pallas import tpu as pltpu

EPSILON = 1e-6
ALPHA = 0.1
BETA = 0.1
MIN_DENOMINATOR = 1e-5   # dead given relu >= 0; kept only for the XLA reference

_LANE = 128        # lane width: output dim padded to a multiple of this
_SUBLANE = 8       # sublane width: batch tile must be a multiple of this
_TM_MAX = 1024     # max batch rows per grid block (VMEM budget caps it further)


def _round_up(n, m):
    return ((n + m - 1) // m) * m


# ------------------------------- kernel ------------------------------------


def _tau_r_kernel(x_ref, w_ref, b_ref, o_ref):
    # x: [TM, D_in] (f32 or bf16)   w: [D_in, 2*Dp] bf16 (progress|risk fused)
    # b: [1, 2*Dp] f32              o: [TM, Dp] f32
    x = x_ref[...].astype(jnp.bfloat16)      # in-kernel cast; no wrapper pass over x
    w = w_ref[...]

    # One fused MXU matmul, f32 accumulation; then split the two halves.
    y = jnp.dot(x, w, preferred_element_type=jnp.float32) + b_ref[...]   # [TM, 2*Dp]
    dp = y.shape[-1] // 2
    progress = jnp.tanh(y[:, :dp])           # tanh branch
    risk = jnp.maximum(y[:, dp:], 0.0)       # relu branch

    numerator = progress + ALPHA
    # relu(risk) >= 0  =>  denominator >= BETA + EPSILON = 0.100001 > 1e-5,
    # so the reference's clamp(min=1e-5) is dead code and dropped.
    denominator = risk + (BETA + EPSILON)
    # EUP approximate reciprocal; the outer tanh saturates, keeping the
    # approximation well inside tolerance.  tanh output is in [-1, 1], so the
    # original clamp(-10, 10) is dead code as well.
    tau = jnp.tanh(numerator * pl.reciprocal(denominator, approx=True))
    o_ref[...] = tau.astype(o_ref.dtype)


# --------------------------- parameter prep --------------------------------


def prepare_tau_r_params(w_progress, b_progress, w_risk, b_risk):
    """One-time parameter prep (keep OUT of the per-call hot path):
    pad d_out to a lane-dense multiple of 128, fuse [progress|risk],
    transpose to [D_in, 2*Dp], cast the weight to bf16."""
    w_progress = jnp.asarray(w_progress, jnp.float32)
    w_risk = jnp.asarray(w_risk, jnp.float32)
    d_out, d_in = w_progress.shape
    assert w_risk.shape == (d_out, d_in)
    dp = _round_up(d_out, _LANE)

    wp = jnp.zeros((dp, d_in), jnp.float32).at[:d_out].set(w_progress)
    wr = jnp.zeros((dp, d_in), jnp.float32).at[:d_out].set(w_risk)
    w_fused = jnp.concatenate([wp, wr], axis=0).T.astype(jnp.bfloat16)   # [D_in, 2*Dp]

    bp = jnp.zeros((dp,), jnp.float32).at[:d_out].set(jnp.asarray(b_progress, jnp.float32))
    br = jnp.zeros((dp,), jnp.float32).at[:d_out].set(jnp.asarray(b_risk, jnp.float32))
    b_fused = jnp.concatenate([bp, br])[None, :]                          # [1, 2*Dp] f32
    # TODO(synk): if d_in is large and not 128-aligned, also pad K here and have
    # the producer emit x with padded K (a per-call wrapper pad of x would cost
    # an extra HBM pass, so it is intentionally not done in tau_r_layer).
    return w_fused, b_fused, d_out


# --------------------------- tiling / VMEM budget ---------------------------


def _vmem_budget_bytes():
    """Usable per-call VMEM budget derived from the device when possible."""
    cap = 64 * 1024 * 1024                 # conservative default (v7x physical)
    try:
        cap = int(pltpu.get_tpu_info().vmem_capacity_bytes)
    except Exception:
        pass
    # ~75% of physical, capped at 100 MiB (v5e/v6e: 128 MiB physical -> 100 MiB;
    # v7x: 64 MiB physical -> ~48 MiB budget).
    return max(min(int(cap * 0.75), 100 * 1024 * 1024), 16 * 1024 * 1024)


def _select_tiling(batch, d_in, dp2, x_itemsize, out_itemsize):
    """Pick the batch tile tm and a matching vmem_limit_bytes."""
    budget = _vmem_budget_bytes()
    dp = dp2 // 2
    # Weight (bf16) + bias (f32) are single-buffered (constant index_map).
    fixed = d_in * dp2 * 2 + dp2 * 4
    # x tile and out tile are double-buffered by the pipeline.
    per_row = 2 * d_in * x_itemsize + 2 * dp * out_itemsize
    avail = max(budget - fixed - (2 << 20), per_row * _SUBLANE)
    tm_cap = max((int(avail // per_row) // _SUBLANE) * _SUBLANE, _SUBLANE)
    tm_cap = min(tm_cap, _TM_MAX)

    if batch >= 32:
        # At least two grid blocks so the "parallel" batch axis can shard
        # across both v7x TensorCores (negligible cost on 1-core v5e/v6e).
        tm_target = _round_up((batch + 1) // 2, _SUBLANE)
    else:
        tm_target = _round_up(max(batch, 1), _SUBLANE)
    tm = max(min(tm_cap, tm_target), _SUBLANE)

    needed = fixed + tm * per_row + (2 << 20)
    # TODO(synk): very large d_in*2*Dp weights (> VMEM budget) would need K/N
    # tiling of the weight; not implemented here.
    vmem_limit = int(max(min(needed, 100 * 1024 * 1024), 8 << 20))
    return tm, vmem_limit


# ------------------------------- wrapper ------------------------------------


def tau_r_layer(x, w_fused, b_fused, d_out, *, use_pallas=True):
    """TauRLayer forward.  x: [B, D_in] (or [D_in]); fused params from
    prepare_tau_r_params.  Returns tau of shape [B, d_out] in float32."""
    x = jnp.asarray(x)
    if x.ndim == 1:
        x = x[None, :]
    if x.dtype not in (jnp.bfloat16, jnp.float32):
        x = x.astype(jnp.float32)
    batch, d_in = x.shape
    dp2 = w_fused.shape[1]
    dp = dp2 // 2
    assert w_fused.shape[0] == d_in
    assert 0 < d_out <= dp

    if not use_pallas:
        # Small-problem fast path: for tiny shapes pallas_call launch overhead
        # dominates and plain XLA fuses the whole epilogue anyway.
        y = x.astype(jnp.float32) @ w_fused.astype(jnp.float32) + b_fused
        progress = jnp.tanh(y[:, :dp])
        risk = jnp.maximum(y[:, dp:], 0.0)
        return jnp.tanh((progress + ALPHA) / (risk + BETA + EPSILON))[:, :d_out]

    tm, vmem_limit = _select_tiling(batch, d_in, dp2, x.dtype.itemsize, 4)
    grid = ((batch + tm - 1) // tm,)

    cost = pl.CostEstimate(
        flops=2 * batch * d_in * dp2,
        transcendentals=3 * batch * dp,
        bytes_accessed=(x.size * x.dtype.itemsize + w_fused.size * 2
                        + b_fused.size * 4 + batch * d_out * 4),
    )

    return pl.pallas_call(
        _tau_r_kernel,
        # No wrapper-side padding or slicing: Pallas masks the ragged last
        # batch block and the lane-padded output columns (block (tm, dp) over
        # the (B, d_out) output).
        out_shape=jax.ShapeDtypeStruct((batch, d_out), jnp.float32),
        grid=grid,
        in_specs=[
            pl.BlockSpec((tm, d_in), lambda i: (i, 0)),
            # Weight/bias: constant index_map -> VMEM-resident across the grid;
            # single-buffered (the second pipeline buffer would be dead VMEM).
            pl.BlockSpec((d_in, dp2), lambda i: (0, 0), pipeline_mode=pl.Buffered(1)),
            pl.BlockSpec((1, dp2), lambda i: (0, 0), pipeline_mode=pl.Buffered(1)),
        ],
        out_specs=pl.BlockSpec((tm, dp), lambda i: (i, 0)),
        compiler_params=pltpu.CompilerParams(
            dimension_semantics=("parallel",),
            vmem_limit_bytes=vmem_limit,
        ),
        cost_estimate=cost,
    )(x, w_fused, b_fused)


# ------------------------------ test harness --------------------------------


def xavier_uniform(key, out_dim, in_dim, gain):
    bound = gain * math.sqrt(6.0 / (in_dim + out_dim))
    return jax.random.uniform(
        key, (out_dim, in_dim), minval=-bound, maxval=bound, dtype=jnp.float32
    )


def tau_r_reference(x, wp, bp, wr, br):
    progress = jnp.tanh(x @ wp.T + bp)
    risk = jax.nn.relu(x @ wr.T + br)
    num = progress + ALPHA
    den = jnp.maximum(risk + BETA + EPSILON, MIN_DENOMINATOR)
    return jnp.clip(jnp.tanh(num / den), -10.0, 10.0)


if __name__ == "__main__":
    key = jax.random.PRNGKey(0)
    k_x, k_wp, k_wr = jax.random.split(key, 3)

    B, D_in, D_out = 8, 32, 16

    x = jax.random.normal(k_x, (B, D_in), dtype=jnp.float32)

    # Deterministic parameter init mirroring the PyTorch __init__:
    #   xavier_uniform_(weight, gain=0.1), zeros_(bias)
    w_progress = xavier_uniform(k_wp, D_out, D_in, gain=0.1)
    b_progress = jnp.zeros((D_out,), jnp.float32)
    w_risk = xavier_uniform(k_wr, D_out, D_in, gain=0.1)
    b_risk = jnp.zeros((D_out,), jnp.float32)

    # One-time parameter fusion/padding (outside the hot path).
    w_fused, b_fused, d_out = prepare_tau_r_params(
        w_progress, b_progress, w_risk, b_risk
    )

    out = jax.block_until_ready(tau_r_layer(x, w_fused, b_fused, d_out))

    # f32 reference; tolerance relaxed because the kernel matmul runs in bf16
    # (f32 accumulation) and uses the EUP approximate reciprocal.
    ref = tau_r_reference(x, w_progress, b_progress, w_risk, b_risk)
    assert out.shape == (B, D_out)
    assert jnp.allclose(out, ref, atol=2e-2, rtol=2e-2), float(
        jnp.max(jnp.abs(out - ref))
    )

    print("KERNEL_OK")
</pallas_src>

<mosaic_0001>
module attributes {stable_mosaic.version = 11 : i64} {
  func.func @_tau_r_kernel(%arg0: i32, %arg1: memref<8x32xf32, #tpu.memory_space<vmem>>, %arg2: memref<32x256xbf16, #tpu.memory_space<vmem>>, %arg3: memref<1x256xf32, #tpu.memory_space<vmem>>, %arg4: memref<8x128xf32, #tpu.memory_space<vmem>>) attributes {dimension_semantics = [#tpu.dimension_semantics<parallel>], iteration_bounds = array<i64: 1>, scalar_prefetch = 0 : i64, scratch_operands = 0 : i64, tpu.core_type = #tpu.core_type<tc>, window_params = [{transform_indices = @transform_0, window_bounds = array<i64: 8, 32>}, {pipeline_mode = #tpu.pipeline_mode<synchronous>, transform_indices = @transform_1, window_bounds = array<i64: 32, 256>}, {pipeline_mode = #tpu.pipeline_mode<synchronous>, transform_indices = @transform_2, window_bounds = array<i64: 1, 256>}, {transform_indices = @transform_3, window_bounds = array<i64: 8, 128>}]} {
    %c0 = arith.constant 0 : index
    %c0_0 = arith.constant 0 : index
    %0 = vector.load %arg1[%c0, %c0_0] : memref<8x32xf32, #tpu.memory_space<vmem>>, vector<8x32xf32>
    %1 = arith.truncf %0 : vector<8x32xf32> to vector<8x32xbf16>
    %c0_1 = arith.constant 0 : index
    %c0_2 = arith.constant 0 : index
    %2 = vector.load %arg2[%c0_1, %c0_2] : memref<32x256xbf16, #tpu.memory_space<vmem>>, vector<32x256xbf16>
    %cst = arith.constant dense<0.000000e+00> : vector<8x256xf32>
    %3 = tpu.matmul %1, %2, %cst {dimension_numbers = #tpu.dot_dimension_numbers<[1], [0], [0], [1], [0, 0, 1, 1], [], []>} : vector<8x32xbf16>, vector<32x256xbf16>, vector<8x256xf32> -> vector<8x256xf32>
    %c0_3 = arith.constant 0 : index
    %c0_4 = arith.constant 0 : index
    %4 = vector.load %arg3[%c0_3, %c0_4] : memref<1x256xf32, #tpu.memory_space<vmem>>, vector<1x256xf32>
    %5 = vector.broadcast %4 : vector<1x256xf32> to vector<8x256xf32>
    %6 = arith.addf %3, %5 : vector<8x256xf32>
    %7 = vector.extract_strided_slice %6 {offsets = [0, 0], sizes = [8, 128], strides = [1, 1]} : vector<8x256xf32> to vector<8x128xf32>
    %8 = math.tanh %7 : vector<8x128xf32>
    %9 = vector.extract_strided_slice %6 {offsets = [0, 128], sizes = [8, 128], strides = [1, 1]} : vector<8x256xf32> to vector<8x128xf32>
    %cst_5 = arith.constant 0.000000e+00 : f32
    %10 = vector.broadcast %cst_5 : f32 to vector<8x128xf32>
    %11 = arith.maximumf %9, %10 : vector<8x128xf32>
    %cst_6 = arith.constant 1.000000e-01 : f32
    %12 = vector.broadcast %cst_6 : f32 to vector<8x128xf32>
    %13 = arith.addf %8, %12 : vector<8x128xf32>
    %cst_7 = arith.constant 1.000010e-01 : f32
    %14 = vector.broadcast %cst_7 : f32 to vector<8x128xf32>
    %15 = arith.addf %11, %14 : vector<8x128xf32>
    %16 = tpu.reciprocal %15 {approx = true} : vector<8x128xf32> -> vector<8x128xf32>
    %17 = arith.mulf %13, %16 : vector<8x128xf32>
    %18 = math.tanh %17 : vector<8x128xf32>
    %c0_8 = arith.constant 0 : index
    %c0_9 = arith.constant 0 : index
    %19 = vector.load %arg4[%c0_8, %c0_9] : memref<8x128xf32, #tpu.memory_space<vmem>>, vector<8x128xf32>
    tpu.vector_store %arg4[%c0_8, %c0_9], %18 {strides = array<i32>} : memref<8x128xf32, #tpu.memory_space<vmem>>, vector<8x128xf32>,
    return
  }
  func.func @transform_0(%arg0: i32) -> (i32, i32) {
    %c0_i32 = arith.constant 0 : i32
    %c0_i32_0 = arith.constant 0 : i32
    return %arg0, %c0_i32 : i32, i32
  }
  func.func @transform_1(%arg0: i32) -> (i32, i32) {
    %c0_i32 = arith.constant 0 : i32
    %c0_i32_0 = arith.constant 0 : i32
    %c0_i32_1 = arith.constant 0 : i32
    return %c0_i32, %c0_i32_0 : i32, i32
  }
  func.func @transform_2(%arg0: i32) -> (i32, i32) {
    %c0_i32 = arith.constant 0 : i32
    %c0_i32_0 = arith.constant 0 : i32
    %c0_i32_1 = arith.constant 0 : i32
    return %c0_i32, %c0_i32_0 : i32, i32
  }
  func.func @transform_3(%arg0: i32) -> (i32, i32) {
    %c0_i32 = arith.constant 0 : i32
    %c0_i32_0 = arith.constant 0 : i32
    return %arg0, %c0_i32 : i32, i32
  }
}

</mosaic_0001>

<bundles_post_ra>
// kernel: tpu_custom_call.1
= control target key start
LH: loop header
LB: loop body
LE: loop exit
PB: predicated region body
PF: predicated region fallthrough
CT: control target
= control target key end

     0   :  { %8 = vsyncpa [#allocation3], 0  ;;  %s276_s0 = inlined_call_operand.hbm [shape: f32[8,32], index: 0, kind: input, shape index: {}]   ;;  %s277_s1 = inlined_call_operand.hbm [shape: bf16[32,256], index: 1, kind: input, shape index: {}]   ;;  %s278_s2 = inlined_call_operand.vmem [shape: f32[1,256], index: 2, kind: input, shape index: {}]   ;;  %s279_s3 = inlined_call_operand.hbm [shape: f32[8,16], index: 3, kind: output, shape index: {}]  }
   0x1   :  { %9 = vsyncpa [#allocation6], 0 }
   0x2   :  { %10 = vsyncpa [#allocation4], 0  ;;  %s238_s12 = smov [#allocation2]   ;;  %s239_s14 = smov [#allocation5]  }
   0x3   :  { %s17_s13 = sshll.u32 %s238_s12, 4  ;;  %s26_s15 = sshll.u32 %s239_s14, 4  ;;  %s18_s13 = int_to_ptr.vmem [resolvable:$true] %s17_s13  ;;  %s27_s15 = int_to_ptr.vmem [resolvable:$true] %s26_s15 }
   0x4   :  { %s180_s16 = scalar_lea.vmem %s18_s13, 128  ;;  %p185_p1 = scmp.lt.s32.totalorder %s18_s13, %s18_s13 }
   0x5   :  { %p181_p0 = scmp.ne.s32.totalorder %s18_s13, %s180_s16  ;;  %p186_p2 = scmp.lt.s32.totalorder %s180_s16, %s180_s16 }
   0x7   :  { %p187_p3 = por %p186_p2, %p185_p1 }
   0x9   :  { %p188_p4 = pnand %p187_p3, %p181_p0 }
   0xb   :  { %191 = shalt.err (!%p188_p4)
}
   0xc   :  { %20 = dma.hbm_to_vmem [thread:$0]  %s276_s0, 128, %s18_s13, [#allocation3]  }
   0xd   :  { %s200_s19 = scalar_lea.vmem %s27_s15, 512  ;;  %p205_p6 = scmp.lt.s32.totalorder %s27_s15, %s27_s15 }
   0xe   :  { %p201_p5 = scmp.ne.s32.totalorder %s27_s15, %s200_s19  ;;  %p206_p7 = scmp.lt.s32.totalorder %s200_s19, %s200_s19 }
  0x10   :  { %p207_p8 = por %p206_p7, %p205_p6 }
  0x12   :  { %p208_p9 = pnand %p207_p8, %p201_p5 }
  0x14   :  { %211 = shalt.err (!%p208_p9)
}
  0x15   :  { %s240_s20 = smov 128   ;;  %s241_s21 = smov 8  }
  0x16   :  { %32 = dma.hbm_to_vmem [thread:$0]  %s277_s1, 512, %s27_s15, [#allocation6], %s240_s20, %s240_s20, %s241_s21  }
  0x17   :  { %232 = dma.done.wait [#allocation3], 128  }
  0x18   :  { %233 = vsyncadd [#allocation3], 4294967168 }
  0x19   :  { %234 = dma.done.wait [#allocation6], 512  }
  0x1a   :  { %235 = vsyncadd [#allocation6], 4294966784  ;;  %v242_v0 = vmov 0   ;;  %v160_v1 = vld [vmem:[#allocation5 + $0x14] ss:$8 sps:$4 sm:$0xff]   ;;  %vm80_vm0 = vcmask 261120   ;;  %v50_v7 = vlaneseq }
  0x1b   :  { %116 = vmatprep.mubr.bf16.mxu0 %v242_v0  ;;  %v162_v2 = vld [vmem:[#allocation5 + $0x10] ss:$8 sps:$4 sm:$0xff]   ;;  %96 = vmatprep.subr.bf16.mxu0 %v160_v1  ;;  %v163_v3 = vld [vmem:[#allocation5 + $0x4] ss:$8 sps:$4 sm:$0xff]   ;;  %v165_v4 = vld [vmem:[#allocation5] ss:$8 sps:$4 sm:$0xff]  }
  0x1c   :  { %97 = vmatpush1.bf16.msra.mxu0 %v162_v2  ;;  %v42_v5 = vld [vmem:[#allocation2] sm:$0xff]  ;;  %v51_v8 = vshrl.u32 %v50_v7, 7  ;;  %s243_s24 = smov [#allocation7]  }
  0x1d   :  { %98 = vmatprep.subr.bf16.mxu0 %v163_v3  ;;  %v43_v6 = vpack.c.bf16 %v42_v5, %v42_v5  ;;  %v48_v10 = vld [vmem:[%s278_s2] sm:$0x3]  ;;  %s139_s2 = sshll.u32 %s243_s24, 4  ;;  %s140_s2 = int_to_ptr.vmem [resolvable:$true] %s139_s2 }
  0x1e   :  { %v52_v9 = vsub.s32 0, %v51_v8  ;;  %v56_v11 = vsub.s32 1, %v51_v8  ;;  %s212_s25 = scalar_lea.vmem %s140_s2, 128  ;;  %p217_p11 = scmp.lt.s32.totalorder %s140_s2, %s140_s2 }
  0x1f   :  { %p213_p10 = scmp.ne.s32.totalorder %s140_s2, %s212_s25  ;;  %p218_p12 = scmp.lt.s32.totalorder %s212_s25, %s212_s25 }
  0x20   :  { %99 = vmatpush1.bf16.msra.mxu0 %v165_v4  ;;  %v53_v12 = vrot.slane %v48_v10, %v52_v9  ;;  %v57_v13 = vrot.slane %v48_v10, %v56_v11 }
  0x21   :  { %p219_p13 = por %p218_p12, %p217_p11 }
  0x23   :  { %153 = vmatmul.mubr.msk.bf16.vlgmr.msra.gmra.mxu0 %vm80_vm0, %v43_v6  ;;  %p220_p0 = pnand %p219_p13, %p213_p10 }
  0xe3   :  { %v118_v14 = vpop.f32.mrf.mxu0 }
  0xe4   :  { %v119_v15 = vadd.f32 %v118_v14, %v53_v12 }
  0xe5   :  { %v120_v16 = vpop.f32.mrf.mxu0 }
  0xe6   :  { %v121_v17 = vadd.f32 %v120_v16, %v57_v13  ;;  %166 = vtanh.f32 %v119_v15 }
  0xe7   :  { %v122_v18 = vpop.f32.mrf.mxu0 }
  0xe8   :  { %v126_v19 = vmax.f32 %v121_v17, 0.0 }
  0xe9   :  { %v123_v20 = vpop.f32.mrf.mxu0 }
  0xea   :  { %v128_v21 = vadd.f32 0.100001, %v126_v19 }
  0xec   :  { %168 = vrcp.f32 %v128_v21 }
  0xf3   :  { %v167_v22 = vpop.eup %166 }
  0xf4   :  { %v127_v23 = vadd.f32 0.1, %v167_v22 }
  0xf9   :  { %v169_v24 = vpop.eup %168 }
  0xfa   :  { %v130_v25 = vmul.f32 %v169_v24, %v127_v23 }
  0xfc   :  { %170 = vtanh.f32 %v130_v25 }
 0x109   :  { %v171_v26 = vpop.eup %170 }
 0x10a   :  { %132 = vst [vmem:[#allocation7] sm:$0xff] %v171_v26 }
 0x10b   :  { %223 = shalt.err (!%p220_p0)
}
 0x10c   :  { %142 = dma.vmem_to_hbm [thread:$0]  %s140_s2, 128, %s279_s3, [#allocation4]  }
 0x10d   :  { %236 = dma.done.wait [#allocation4], 128  }
 0x10e   :  { %237 = vsyncadd [#allocation4], 4294967168 }
 0x10f   :  { %146 = vsyncpa [#allocation3], 1 }
 0x110   :  { %147 = vsyncpa [#allocation6], 1 }
 0x111   :  { %148 = vsyncpa [#allocation4], 1 }

</bundles_post_ra>
